<compile_context>
chip_gen: v7x
topology: tpu7x:2x2x1
jax: 0.10.0
libtpu: 0.0.40
codegen_flags: <defaults>
</compile_context>

<pallas_src>
import functools
from typing import NamedTuple

import jax
import jax.numpy as jnp
from jax.experimental import pallas as pl
from jax.experimental.pallas import tpu as pltpu

LANE = 128
SUBLANE = 8


def _round_up(n, m):
    return ((n + m - 1) // m) * m


def _tile_bytes(rows, cols, itemsize):
    # VMEM layout pads (sublane, lane); bf16 packs 2 rows per sublane.
    sub = SUBLANE * (4 // itemsize)
    return _round_up(max(rows, 1), sub) * _round_up(max(cols, 1), LANE) * itemsize


def _vmem_capacity_bytes():
    """Per-TensorCore VMEM capacity (generation-aware, conservative default)."""
    try:
        info = pltpu.get_tpu_info()
        for name in ("vmem_capacity_bytes", "vmem_bytes", "vmem_size_bytes"):
            v = getattr(info, name, None)
            if v:
                return int(v)
    except Exception:
        pass
    try:
        kind = jax.devices()[0].device_kind.lower()
        if any(t in kind for t in ("v4", "v5", "v6")):
            return 128 << 20
    except Exception:
        pass
    return 64 << 20          # v7x: 64 MiB per TensorCore


# --------------------------------------------------------------------------
# One-time parameter preparation (hoisted out of the forward path).
# --------------------------------------------------------------------------
class PreparedEncoder(NamedTuple):
    dims: tuple       # raw feature sizes (in, h1, ..., out)
    dims_pad: tuple   # feature sizes as seen by the kernels
    weights: tuple    # bf16 [dims_pad[i], dims_pad[i+1]]
    biases: tuple     # f32  [1, dims_pad[i+1]]


def prepare_params(params):
    """Pad + cast weights once. params: list of (w, b); w: [in, out], b: [out]."""
    if not params:
        raise ValueError("Encoder needs at least one Linear layer")
    n = len(params)
    dims = [params[0][0].shape[0]] + [w.shape[1] for w, _ in params]
    for i in range(1, n):
        if params[i][0].shape[0] != dims[i]:
            raise ValueError("layer size mismatch in params")

    dims_pad = [dims[0]]                            # layer-0 contraction: unpadded
    for i in range(1, n):
        dims_pad.append(_round_up(dims[i], LANE))   # hidden dims: lane-dense
    out = dims[n]                                   # narrow head: keep raw width
    dims_pad.append(out if out < LANE else _round_up(out, LANE))

    # Note: optional fp8 weight quantization for v7x (accuracy-gated) is not
    # implemented; bf16 weights are used on all generations.
    ws, bs = [], []
    for i, (w, b) in enumerate(params):
        kin, kout = w.shape
        w_p = jnp.zeros((dims_pad[i], dims_pad[i + 1]), jnp.float32)
        w_p = w_p.at[:kin, :kout].set(w.astype(jnp.float32)).astype(jnp.bfloat16)
        b_p = jnp.zeros((1, dims_pad[i + 1]), jnp.float32)
        b_p = b_p.at[0, :kout].set(b.astype(jnp.float32))
        ws.append(w_p)
        bs.append(b_p)
    return PreparedEncoder(tuple(dims), tuple(dims_pad), tuple(ws), tuple(bs))


# --------------------------------------------------------------------------
# Fused path: whole layer chain in one kernel, weights VMEM-resident.
# --------------------------------------------------------------------------
def _fused_encoder_kernel(*refs, n_layers):
    # refs = (x, w0, b0, ..., w_{n-1}, b_{n-1}, out). Intermediates stay in
    # vregs/VMEM and never round-trip HBM.
    x_ref, o_ref = refs[0], refs[-1]
    h = x_ref[...]
    if h.dtype != jnp.bfloat16:
        h = h.astype(jnp.bfloat16)
    y = None
    for li in range(n_layers):
        w = refs[1 + 2 * li][...]                         # bf16 MXU operand
        b = refs[2 + 2 * li][...]                         # f32 bias row
        y = jnp.dot(h, w, preferred_element_type=jnp.float32)   # f32 accumulate
        y = jnp.maximum(y + b, 0.0)                       # f32 bias + ReLU
        if li + 1 < n_layers:
            h = y.astype(jnp.bfloat16)
    o_ref[...] = y.astype(o_ref.dtype)


def _fused_weight_bytes(dims_pad, buffers):
    total = 0
    for i in range(len(dims_pad) - 1):
        total += buffers * _tile_bytes(dims_pad[i], dims_pad[i + 1], 2)  # bf16 W
        total += buffers * _tile_bytes(1, dims_pad[i + 1], 4)            # f32 b
    return total


def _fused_row_bytes(dims_pad, x_itemsize):
    # double-buffered x tile + double-buffered out tile + intermediate
    # activations (f32 value + bf16 operand copy) that may spill to VMEM.
    b = 2 * _round_up(dims_pad[0], LANE) * x_itemsize
    b += 3 * _round_up(dims_pad[-1], LANE) * 4
    for d in dims_pad[1:-1]:
        b += _round_up(d, LANE) * 6
    return b


def _fused_call(x_p, prep, tm, single_buffer_weights, vmem_limit):
    n_layers = len(prep.weights)
    dims_pad = prep.dims_pad
    m_pad = x_p.shape[0]

    # Constant-index weight/bias blocks: single-buffered (never re-fetched).
    wkw = {"pipeline_mode": pl.Buffered(1)} if single_buffer_weights else {}
    in_specs = [pl.BlockSpec((tm, dims_pad[0]), lambda i: (i, 0))]
    args = [x_p]
    for li in range(n_layers):
        in_specs.append(pl.BlockSpec((dims_pad[li], dims_pad[li + 1]),
                                     lambda i: (0, 0), **wkw))
        in_specs.append(pl.BlockSpec((1, dims_pad[li + 1]),
                                     lambda i: (0, 0), **wkw))
        args += [prep.weights[li], prep.biases[li]]

    flops = 2 * m_pad * sum(dims_pad[i] * dims_pad[i + 1]
                            for i in range(n_layers))
    bytes_accessed = (int(x_p.size) * x_p.dtype.itemsize
                      + m_pad * dims_pad[-1] * 4
                      + sum(int(a.size) * a.dtype.itemsize for a in args[1:]))

    return pl.pallas_call(
        functools.partial(_fused_encoder_kernel, n_layers=n_layers),
        out_shape=jax.ShapeDtypeStruct((m_pad, dims_pad[-1]), jnp.float32),
        grid=(m_pad // tm,),
        in_specs=in_specs,
        out_specs=pl.BlockSpec((tm, dims_pad[-1]), lambda i: (i, 0)),
        compiler_params=pltpu.CompilerParams(
            dimension_semantics=("parallel",),
            vmem_limit_bytes=int(vmem_limit)),
        cost_estimate=pl.CostEstimate(flops=flops, transcendentals=0,
                                      bytes_accessed=bytes_accessed),
    )(*args)


# --------------------------------------------------------------------------
# Fallback path: per-layer M/N/K-tiled matmul + bias + ReLU.
# --------------------------------------------------------------------------
def _linear_relu_kernel(x_ref, w_ref, b_ref, o_ref, acc_ref):
    @pl.when(pl.program_id(2) == 0)
    def _():
        acc_ref[...] = jnp.zeros_like(acc_ref)

    x = x_ref[...]
    if x.dtype != jnp.bfloat16:
        x = x.astype(jnp.bfloat16)
    acc_ref[...] += jnp.dot(x, w_ref[...], preferred_element_type=jnp.float32)

    @pl.when(pl.program_id(2) == pl.num_programs(2) - 1)
    def _():
        o_ref[...] = jnp.maximum(acc_ref[...] + b_ref[...], 0.0).astype(o_ref.dtype)


def _pick_tile(n, prefs=(512, 256, 128)):
    for t in prefs:
        if n >= t and n % t == 0:
            return t
    return n


def _linear_relu(x_p, w, b, out_dtype, tm, capacity):
    m_pad, K = x_p.shape
    _, N = w.shape
    tn = _pick_tile(N)
    tk = _pick_tile(K)
    needed = (2 * _tile_bytes(tm, tk, x_p.dtype.itemsize)
              + 2 * _tile_bytes(tk, tn, 2)
              + 2 * _tile_bytes(1, tn, 4)
              + 2 * _tile_bytes(tm, tn, jnp.dtype(out_dtype).itemsize)
              + _tile_bytes(tm, tn, 4))
    vmem_limit = int(min(capacity - (2 << 20), needed + max(needed, 16 << 20)))
    return pl.pallas_call(
        _linear_relu_kernel,
        out_shape=jax.ShapeDtypeStruct((m_pad, N), out_dtype),
        grid=(m_pad // tm, N // tn, K // tk),
        in_specs=[pl.BlockSpec((tm, tk), lambda i, j, k: (i, k)),
                  pl.BlockSpec((tk, tn), lambda i, j, k: (k, j)),
                  pl.BlockSpec((1, tn), lambda i, j, k: (0, j))],
        out_specs=pl.BlockSpec((tm, tn), lambda i, j, k: (i, j)),
        scratch_shapes=[pltpu.VMEM((tm, tn), jnp.float32)],
        compiler_params=pltpu.CompilerParams(
            dimension_semantics=("parallel", "parallel", "arbitrary"),
            vmem_limit_bytes=vmem_limit),
    )(x_p, w, b)


# --------------------------------------------------------------------------
# Forward wrapper.
# --------------------------------------------------------------------------
def _choose_tm(m8, cap):
    cap = max(SUBLANE, (cap // SUBLANE) * SUBLANE)
    if m8 <= cap:
        return m8                              # single tile, zero padding waste
    cands = []
    for tm in (512, 256, 128, 64, 32, 16, 8):
        if tm > cap:
            continue
        m_pad = _round_up(m8, tm)
        nblk = m_pad // tm
        # minimize padding waste, prefer >=4 grid steps (megacore/pipelining),
        # then larger tiles (less per-step overhead).
        cands.append(((m_pad - m8, 0 if nblk >= 4 else 1, -tm), tm))
    return min(cands)[1]


def encoder_forward(x, params, *, force_fallback=False):
    """y = relu(... relu(x @ W0 + b0) ... @ W_{n-1} + b_{n-1}).

    x: [..., in_features], float32 or bfloat16 (bf16 halves activation HBM).
    params: PreparedEncoder (preferred, one-time prep) or raw list of (w, b).
    """
    if not isinstance(params, PreparedEncoder):
        params = prepare_params(params)        # slow path: per-call prep
    prep = params
    n_layers = len(prep.weights)

    lead = x.shape[:-1]
    K0 = x.shape[-1]
    if K0 != prep.dims[0]:
        raise ValueError(f"input feature dim {K0} != expected {prep.dims[0]}")
    x2 = x.reshape(-1, K0)
    M = x2.shape[0]
    m8 = _round_up(max(M, 1), SUBLANE)

    capacity = _vmem_capacity_bytes()
    budget = capacity * 3 // 4                          # residency budget
    gen_cap = 512 if capacity >= (96 << 20) else 256    # smaller tiles on v7x

    x_item = jnp.dtype(x2.dtype).itemsize
    w_bytes1 = _fused_weight_bytes(prep.dims_pad, buffers=1)
    row_bytes = _fused_row_bytes(prep.dims_pad, x_item)
    avail = budget - w_bytes1
    fused_cap = min(gen_cap, avail // row_bytes) if avail > 0 else 0
    use_fused = (not force_fallback) and fused_cap >= SUBLANE

    tm = _choose_tm(m8, fused_cap if use_fused else gen_cap)
    m_pad = _round_up(m8, tm)

    # Pad batch rows only when needed (padded rows yield relu(b); sliced off).
    if m_pad == M:
        x_p = x2
    else:
        x_p = jnp.zeros((m_pad, K0), x2.dtype).at[:M].set(x2)

    if use_fused:
        needed = w_bytes1 + tm * row_bytes
        vmem_limit = min(capacity - (2 << 20), needed + max(needed, 16 << 20))
        try:
            out = _fused_call(x_p, prep, tm, True, vmem_limit)
        except Exception:
            # pipeline_mode=pl.Buffered(1) unsupported -> default double buffer.
            needed = _fused_weight_bytes(prep.dims_pad, 2) + tm * row_bytes
            vmem_limit = min(capacity - (2 << 20), needed + max(needed, 16 << 20))
            out = _fused_call(x_p, prep, tm, False, vmem_limit)
    else:
        # Layers too large for full VMEM residency (or forced): one tiled
        # matmul+bias+ReLU kernel per layer, bf16 intermediates in HBM.
        h = x_p
        for li in range(n_layers):
            out_dtype = jnp.float32 if li == n_layers - 1 else jnp.bfloat16
            h = _linear_relu(h, prep.weights[li], prep.biases[li],
                             out_dtype, tm, capacity)
        out = h

    if m_pad != M or prep.dims_pad[-1] != prep.dims[-1]:
        out = out[:M, :prep.dims[-1]]
    return out.reshape(*lead, prep.dims[-1])


# --------------------------------------------------------------------------
# Parameter init (mimics torch.nn.Linear default init) + demo.
# --------------------------------------------------------------------------
def init_linear_params(key, in_features, out_features):
    kw, kb = jax.random.split(key)
    bound = 1.0 / jnp.sqrt(jnp.array(in_features, jnp.float32))
    w = jax.random.uniform(kw, (in_features, out_features), jnp.float32,
                           -bound, bound)
    b = jax.random.uniform(kb, (out_features,), jnp.float32, -bound, bound)
    return w, b


def build_encoder_params(key, layer_sizes):
    keys = jax.random.split(key, len(layer_sizes) - 1)
    return [init_linear_params(keys[i], layer_sizes[i], layer_sizes[i + 1])
            for i in range(len(layer_sizes) - 1)]


if __name__ == "__main__":
    key = jax.random.PRNGKey(0)
    layer_sizes = [32, 16, 8]   # Encoder: Linear(32->16)+ReLU, Linear(16->8)+ReLU
    batch = 8

    kparam, kx = jax.random.split(key)
    params = build_encoder_params(kparam, layer_sizes)
    prepared = prepare_params(params)          # one-time, hoisted out of forward
    x = jax.random.normal(kx, (batch, layer_sizes[0]), dtype=jnp.float32)

    out = jax.block_until_ready(encoder_forward(x, prepared))
    # Also exercise the per-layer tiled fallback path (used for huge layers).
    out_fb = jax.block_until_ready(
        encoder_forward(x, prepared, force_fallback=True))

    # Pure-JAX f32 reference (kernel uses bf16 matmul operands -> loose tol).
    ref = x
    for w, b in params:
        ref = jnp.maximum(ref @ w + b, 0.0)

    assert out.shape == (batch, layer_sizes[-1])
    assert jnp.allclose(out, ref, atol=2e-2, rtol=2e-2), \
        float(jnp.max(jnp.abs(out - ref)))
    assert jnp.allclose(out_fb, ref, atol=2e-2, rtol=2e-2), \
        float(jnp.max(jnp.abs(out_fb - ref)))

    print("KERNEL_OK")
</pallas_src>

<mosaic_0001>
module attributes {stable_mosaic.version = 11 : i64} {
  func.func @_fused_encoder_kernel(%arg0: i32, %arg1: memref<8x32xf32, #tpu.memory_space<vmem>>, %arg2: memref<32x128xbf16, #tpu.memory_space<vmem>>, %arg3: memref<1x128xf32, #tpu.memory_space<vmem>>, %arg4: memref<128x8xbf16, #tpu.memory_space<vmem>>, %arg5: memref<1x8xf32, #tpu.memory_space<vmem>>, %arg6: memref<8x8xf32, #tpu.memory_space<vmem>>) attributes {dimension_semantics = [#tpu.dimension_semantics<parallel>], iteration_bounds = array<i64: 1>, scalar_prefetch = 0 : i64, scratch_operands = 0 : i64, tpu.core_type = #tpu.core_type<tc>, window_params = [{transform_indices = @transform_0, window_bounds = array<i64: 8, 32>}, {pipeline_mode = #tpu.pipeline_mode<synchronous>, transform_indices = @transform_1, window_bounds = array<i64: 32, 128>}, {pipeline_mode = #tpu.pipeline_mode<synchronous>, transform_indices = @transform_2, window_bounds = array<i64: 1, 128>}, {pipeline_mode = #tpu.pipeline_mode<synchronous>, transform_indices = @transform_3, window_bounds = array<i64: 128, 8>}, {pipeline_mode = #tpu.pipeline_mode<synchronous>, transform_indices = @transform_4, window_bounds = array<i64: 1, 8>}, {transform_indices = @transform_5, window_bounds = array<i64: 8, 8>}]} {
    %c0 = arith.constant 0 : index
    %c0_0 = arith.constant 0 : index
    %0 = vector.load %arg1[%c0, %c0_0] : memref<8x32xf32, #tpu.memory_space<vmem>>, vector<8x32xf32>
    %1 = arith.truncf %0 : vector<8x32xf32> to vector<8x32xbf16>
    %c0_1 = arith.constant 0 : index
    %c0_2 = arith.constant 0 : index
    %2 = vector.load %arg2[%c0_1, %c0_2] : memref<32x128xbf16, #tpu.memory_space<vmem>>, vector<32x128xbf16>
    %c0_3 = arith.constant 0 : index
    %c0_4 = arith.constant 0 : index
    %3 = vector.load %arg3[%c0_3, %c0_4] : memref<1x128xf32, #tpu.memory_space<vmem>>, vector<1x128xf32>
    %cst = arith.constant dense<0.000000e+00> : vector<8x128xf32>
    %4 = tpu.matmul %1, %2, %cst {dimension_numbers = #tpu.dot_dimension_numbers<[1], [0], [0], [1], [0, 0, 1, 1], [], []>} : vector<8x32xbf16>, vector<32x128xbf16>, vector<8x128xf32> -> vector<8x128xf32>
    %5 = vector.broadcast %3 : vector<1x128xf32> to vector<8x128xf32>
    %6 = arith.addf %4, %5 : vector<8x128xf32>
    %cst_5 = arith.constant 0.000000e+00 : f32
    %7 = vector.broadcast %cst_5 : f32 to vector<8x128xf32>
    %8 = arith.maximumf %6, %7 : vector<8x128xf32>
    %9 = arith.truncf %8 : vector<8x128xf32> to vector<8x128xbf16>
    %c0_6 = arith.constant 0 : index
    %c0_7 = arith.constant 0 : index
    %10 = vector.load %arg4[%c0_6, %c0_7] : memref<128x8xbf16, #tpu.memory_space<vmem>>, vector<128x8xbf16>
    %c0_8 = arith.constant 0 : index
    %c0_9 = arith.constant 0 : index
    %11 = vector.load %arg5[%c0_8, %c0_9] : memref<1x8xf32, #tpu.memory_space<vmem>>, vector<1x8xf32>
    %cst_10 = arith.constant dense<0.000000e+00> : vector<8x8xf32>
    %12 = tpu.matmul %9, %10, %cst_10 {dimension_numbers = #tpu.dot_dimension_numbers<[1], [0], [0], [1], [0, 0, 1, 1], [], []>} : vector<8x128xbf16>, vector<128x8xbf16>, vector<8x8xf32> -> vector<8x8xf32>
    %13 = vector.broadcast %11 : vector<1x8xf32> to vector<8x8xf32>
    %14 = arith.addf %12, %13 : vector<8x8xf32>
    %cst_11 = arith.constant 0.000000e+00 : f32
    %15 = vector.broadcast %cst_11 : f32 to vector<8x8xf32>
    %16 = arith.maximumf %14, %15 : vector<8x8xf32>
    %c0_12 = arith.constant 0 : index
    %c0_13 = arith.constant 0 : index
    %17 = vector.load %arg6[%c0_12, %c0_13] : memref<8x8xf32, #tpu.memory_space<vmem>>, vector<8x8xf32>
    tpu.vector_store %arg6[%c0_12, %c0_13], %16 {strides = array<i32>} : memref<8x8xf32, #tpu.memory_space<vmem>>, vector<8x8xf32>,
    return
  }
  func.func @transform_0(%arg0: i32) -> (i32, i32) {
    %c0_i32 = arith.constant 0 : i32
    %c0_i32_0 = arith.constant 0 : i32
    return %arg0, %c0_i32 : i32, i32
  }
  func.func @transform_1(%arg0: i32) -> (i32, i32) {
    %c0_i32 = arith.constant 0 : i32
    %c0_i32_0 = arith.constant 0 : i32
    %c0_i32_1 = arith.constant 0 : i32
    return %c0_i32, %c0_i32_0 : i32, i32
  }
  func.func @transform_2(%arg0: i32) -> (i32, i32) {
    %c0_i32 = arith.constant 0 : i32
    %c0_i32_0 = arith.constant 0 : i32
    %c0_i32_1 = arith.constant 0 : i32
    return %c0_i32, %c0_i32_0 : i32, i32
  }
  func.func @transform_3(%arg0: i32) -> (i32, i32) {
    %c0_i32 = arith.constant 0 : i32
    %c0_i32_0 = arith.constant 0 : i32
    %c0_i32_1 = arith.constant 0 : i32
    return %c0_i32, %c0_i32_0 : i32, i32
  }
  func.func @transform_4(%arg0: i32) -> (i32, i32) {
    %c0_i32 = arith.constant 0 : i32
    %c0_i32_0 = arith.constant 0 : i32
    %c0_i32_1 = arith.constant 0 : i32
    return %c0_i32, %c0_i32_0 : i32, i32
  }
  func.func @transform_5(%arg0: i32) -> (i32, i32) {
    %c0_i32 = arith.constant 0 : i32
    %c0_i32_0 = arith.constant 0 : i32
    return %arg0, %c0_i32 : i32, i32
  }
}

module attributes {stable_mosaic.version = 11 : i64} {
  func.func @_fused_encoder_kernel(%arg0: i32, %arg1: memref<8x32xf32, #tpu.memory_space<vmem>>, %arg2: memref<32x128xbf16, #tpu.memory_space<vmem>>, %arg3: memref<1x128xf32, #tpu.memory_space<vmem>>, %arg4: memref<128x8xbf16, #tpu.memory_space<vmem>>, %arg5: memref<1x8xf32, #tpu.memory_space<vmem>>, %arg6: memref<8x8xf32, #tpu.memory_space<vmem>>) attributes {dimension_semantics = [#tpu.dimension_semantics<parallel>], iteration_bounds = array<i64: 1>, scalar_prefetch = 0 : i64, scratch_operands = 0 : i64, tpu.core_type = #tpu.core_type<tc>, window_params = [{transform_indices = @transform_0, window_bounds = array<i64: 8, 32>}, {pipeline_mode = #tpu.pipeline_mode<synchronous>, transform_indices = @transform_1, window_bounds = array<i64: 32, 128>}, {pipeline_mode = #tpu.pipeline_mode<synchronous>, transform_indices = @transform_2, window_bounds = array<i64: 1, 128>}, {pipeline_mode = #tpu.pipeline_mode<synchronous>, transform_indices = @transform_3, window_bounds = array<i64: 128, 8>}, {pipeline_mode = #tpu.pipeline_mode<synchronous>, transform_indices = @transform_4, window_bounds = array<i64: 1, 8>}, {transform_indices = @transform_5, window_bounds = array<i64: 8, 8>}]} {
    %c0 = arith.constant 0 : index
    %c0_0 = arith.constant 0 : index
    %0 = vector.load %arg1[%c0, %c0_0] : memref<8x32xf32, #tpu.memory_space<vmem>>, vector<8x32xf32>
    %1 = arith.truncf %0 : vector<8x32xf32> to vector<8x32xbf16>
    %c0_1 = arith.constant 0 : index
    %c0_2 = arith.constant 0 : index
    %2 = vector.load %arg2[%c0_1, %c0_2] : memref<32x128xbf16, #tpu.memory_space<vmem>>, vector<32x128xbf16>
    %c0_3 = arith.constant 0 : index
    %c0_4 = arith.constant 0 : index
    %3 = vector.load %arg3[%c0_3, %c0_4] : memref<1x128xf32, #tpu.memory_space<vmem>>, vector<1x128xf32>
    %cst = arith.constant dense<0.000000e+00> : vector<8x128xf32>
    %4 = tpu.matmul %1, %2, %cst {dimension_numbers = #tpu.dot_dimension_numbers<[1], [0], [0], [1], [0, 0, 1, 1], [], []>} : vector<8x32xbf16>, vector<32x128xbf16>, vector<8x128xf32> -> vector<8x128xf32>
    %5 = vector.broadcast %3 : vector<1x128xf32> to vector<8x128xf32>
    %6 = arith.addf %4, %5 : vector<8x128xf32>
    %cst_5 = arith.constant 0.000000e+00 : f32
    %7 = vector.broadcast %cst_5 : f32 to vector<8x128xf32>
    %8 = arith.maximumf %6, %7 : vector<8x128xf32>
    %9 = arith.truncf %8 : vector<8x128xf32> to vector<8x128xbf16>
    %c0_6 = arith.constant 0 : index
    %c0_7 = arith.constant 0 : index
    %10 = vector.load %arg4[%c0_6, %c0_7] : memref<128x8xbf16, #tpu.memory_space<vmem>>, vector<128x8xbf16>
    %c0_8 = arith.constant 0 : index
    %c0_9 = arith.constant 0 : index
    %11 = vector.load %arg5[%c0_8, %c0_9] : memref<1x8xf32, #tpu.memory_space<vmem>>, vector<1x8xf32>
    %cst_10 = arith.constant dense<0.000000e+00> : vector<8x8xf32>
    %12 = tpu.matmul %9, %10, %cst_10 {dimension_numbers = #tpu.dot_dimension_numbers<[1], [0], [0], [1], [0, 0, 1, 1], [], []>} : vector<8x128xbf16>, vector<128x8xbf16>, vector<8x8xf32> -> vector<8x8xf32>
    %13 = vector.broadcast %11 : vector<1x8xf32> to vector<8x8xf32>
    %14 = arith.addf %12, %13 : vector<8x8xf32>
    %cst_11 = arith.constant 0.000000e+00 : f32
    %15 = vector.broadcast %cst_11 : f32 to vector<8x8xf32>
    %16 = arith.maximumf %14, %15 : vector<8x8xf32>
    %c0_12 = arith.constant 0 : index
    %c0_13 = arith.constant 0 : index
    %17 = vector.load %arg6[%c0_12, %c0_13] : memref<8x8xf32, #tpu.memory_space<vmem>>, vector<8x8xf32>
    tpu.vector_store %arg6[%c0_12, %c0_13], %16 {strides = array<i32>} : memref<8x8xf32, #tpu.memory_space<vmem>>, vector<8x8xf32>,
    return
  }
  func.func @transform_0(%arg0: i32) -> (i32, i32) {
    %c0_i32 = arith.constant 0 : i32
    %c0_i32_0 = arith.constant 0 : i32
    return %arg0, %c0_i32 : i32, i32
  }
  func.func @transform_1(%arg0: i32) -> (i32, i32) {
    %c0_i32 = arith.constant 0 : i32
    %c0_i32_0 = arith.constant 0 : i32
    %c0_i32_1 = arith.constant 0 : i32
    return %c0_i32, %c0_i32_0 : i32, i32
  }
  func.func @transform_2(%arg0: i32) -> (i32, i32) {
    %c0_i32 = arith.constant 0 : i32
    %c0_i32_0 = arith.constant 0 : i32
    %c0_i32_1 = arith.constant 0 : i32
    return %c0_i32, %c0_i32_0 : i32, i32
  }
  func.func @transform_3(%arg0: i32) -> (i32, i32) {
    %c0_i32 = arith.constant 0 : i32
    %c0_i32_0 = arith.constant 0 : i32
    %c0_i32_1 = arith.constant 0 : i32
    return %c0_i32, %c0_i32_0 : i32, i32
  }
  func.func @transform_4(%arg0: i32) -> (i32, i32) {
    %c0_i32 = arith.constant 0 : i32
    %c0_i32_0 = arith.constant 0 : i32
    %c0_i32_1 = arith.constant 0 : i32
    return %c0_i32, %c0_i32_0 : i32, i32
  }
  func.func @transform_5(%arg0: i32) -> (i32, i32) {
    %c0_i32 = arith.constant 0 : i32
    %c0_i32_0 = arith.constant 0 : i32
    return %arg0, %c0_i32 : i32, i32
  }
}

</mosaic_0001>

<bundles_post_ra>
// kernel: tpu_custom_call.1
= control target key start
LH: loop header
LB: loop body
LE: loop exit
PB: predicated region body
PF: predicated region fallthrough
CT: control target
= control target key end

     0   :  { %v311_v1 = vmov 0.0   ;;  %vm312_vm0 = vmmov 0   ;;  %vm47_vm1 = vcmask 261120   ;;  %s395_s0 = inlined_call_operand.vmem [shape: f32[8,32], index: 0, kind: input, shape index: {}]   ;;  %s396_s1 = inlined_call_operand.vmem [shape: bf16[32,128], index: 1, kind: input, shape index: {}]   ;;  %s397_s2 = inlined_call_operand.vmem [shape: f32[1,128], index: 2, kind: input, shape index: {}]   ;;  %s398_s3 = inlined_call_operand.vmem [shape: bf16[128,8], index: 3, kind: input, shape index: {}]   ;;  %s399_s4 = inlined_call_operand.vmem [shape: f32[1,8], index: 4, kind: input, shape index: {}]   ;;  %s400_s5 = inlined_call_operand.hbm [shape: f32[8,8], index: 5, kind: output, shape index: {}]  }
   0x1   :  { %v277_v0 = vld [vmem:[%s396_s1] sm:$0xff]   ;;  %246 = vmatprep.subr.bf16.mxu0 %v311_v1  ;;  %v278_v2 = vld [vmem:[%s396_s1 + $0x8] sm:$0xff]   ;;  %254 = vmatprep.subr.bf16.mxu1 %v311_v1  ;;  %v281_v7 = vld [vmem:[%s398_s3 + $0x10] sm:$0xff]  }
   0x2   :  { %247 = vmatpush3.bf16.msra.mxu0 %v277_v0  ;;  %250 = vmatprep.mubr.msk.bf16.mxu0 %vm312_vm0, %v311_v1  ;;  %v22_v3 = vld [vmem:[%s395_s0] sm:$0xff]  ;;  %v280_v6 = vld [vmem:[%s398_s3 + $0x8] sm:$0xff]  }
   0x3   :  { %248 = vmatprep.subr.bf16.mxu0 %v311_v1  ;;  %v279_v4 = vld [vmem:[%s398_s3] sm:$0xff]   ;;  %270 = vmatprep.mubr.msk.bf16.mxu1 %vm312_vm0, %v311_v1  ;;  %v23_v5 = vpack.c.bf16 %v22_v3, %v22_v3 }
   0x4   :  { %255 = vmatpush3.bf16.msra.mxu1 %v279_v4 }
   0x5   :  { %256 = vmatprep.subr.bf16.mxu1 %v311_v1 }
   0x6   :  { %249 = vmatpush3.bf16.msra.mxu0 %v278_v2 }
   0x8   :  { %257 = vmatpush3.bf16.msra.mxu1 %v280_v6 }
   0x9   :  { %251 = vmatmul.mubr.msk.bf16.vlgmr.msra.gmra.mrb[0].mxu0 %vm47_vm1, %v23_v5  ;;  %258 = vmatprep.subr.bf16.mxu1 %v311_v1 }
   0xa   :  { %10 = vsyncpa [#allocation3], 0  ;;  %v282_v8 = vld [vmem:[%s398_s3 + $0x18] sm:$0xff]   ;;  %v283_v9 = vld [vmem:[%s398_s3 + $0x20] sm:$0xff]   ;;  %s313_s17 = smov [#allocation2]   ;;  %vm205_vm2 = vcmask 64512  }
   0xb   :  { %v284_v10 = vld [vmem:[%s398_s3 + $0x28] sm:$0xff]   ;;  %v285_v11 = vld [vmem:[%s398_s3 + $0x30] sm:$0xff]   ;;  %v286_v12 = vld [vmem:[%s398_s3 + $0x38] sm:$0xff]   ;;  %s213_s3 = sshll.u32 %s313_s17, 4  ;;  %s214_s3 = int_to_ptr.vmem [resolvable:$true] %s213_s3 }
   0xc   :  { %259 = vmatpush3.bf16.msra.mxu1 %v281_v7  ;;  %v221_v13 = vld [vmem:[%s397_s2] ss:$0 sm:$0xff]  ;;  %s287_s2 = scalar_lea.vmem %s214_s3, 128  ;;  %p292_p1 = scmp.lt.s32.totalorder %s214_s3, %s214_s3 }
   0xd   :  { %260 = vmatprep.subr.bf16.mxu1 %v311_v1  ;;  %v225_v21 = vld [vmem:[%s399_s4] ss:$0 sm:$0xff]  ;;  %p288_p0 = scmp.ne.s32.totalorder %s214_s3, %s287_s2  ;;  %p293_p2 = scmp.lt.s32.totalorder %s287_s2, %s287_s2 }
   0xf   :  { %p294_p3 = por %p293_p2, %p292_p1 }
  0x10   :  { %261 = vmatpush3.bf16.msra.mxu1 %v282_v8 }
  0x11   :  { %262 = vmatprep.subr.bf16.mxu1 %v311_v1  ;;  %p295_p4 = pnand %p294_p3, %p288_p0 }
  0x14   :  { %263 = vmatpush3.bf16.msra.mxu1 %v283_v9 }
  0x15   :  { %264 = vmatprep.subr.bf16.mxu1 %v311_v1 }
  0x18   :  { %265 = vmatpush3.bf16.msra.mxu1 %v284_v10 }
  0x19   :  { %266 = vmatprep.subr.bf16.mxu1 %v311_v1 }
  0x1c   :  { %267 = vmatpush3.bf16.msra.mxu1 %v285_v11 }
  0x1d   :  { %268 = vmatprep.subr.bf16.mxu1 %v311_v1 }
  0x20   :  { %269 = vmatpush3.bf16.msra.mxu1 %v286_v12 }
  0xdc   :  { %v85_v14 = vpop.f32.mrb[0].mxu0 }
  0xdd   :  { %v86_v15 = vadd.f32 %v221_v13, %v85_v14  ;;  %v252_v16 = vpop.f32.mrb[1].mxu0 }
  0xde   :  { %v88_v17 = vpop.f32.mrb[2].mxu0 }
  0xdf   :  { %v91_v18 = vmax.f32 %v86_v15, 0.0  ;;  %v253_v19 = vpop.f32.mrb[3].mxu0 }
  0xe1   :  { %v92_v20 = vpack.c.bf16 %v91_v18, %v91_v18 }
  0xe3   :  { %271 = vmatmul.mubr.bf16.vlgmr.msra.gmra.mrb[0].mxu1 %v92_v20 }
 0x1b6   :  { %v198_v22 = vpop.f32.mrb[0].mxu1 }
 0x1b7   :  { %v199_v23 = vadd.f32 %v225_v21, %v198_v22  ;;  %v272_v24 = vpop.f32.mrb[1].mxu1 }
 0x1b8   :  { %v201_v25 = vpop.f32.mrb[2].mxu1 }
 0x1b9   :  { %v204_v26 = vmax.f32 %v199_v23, 0.0  ;;  %v273_v27 = vpop.f32.mrb[3].mxu1 }
 0x1bb   :  { %206 = vst.msk [vmem:[#allocation2] sm:$0xff] %vm205_vm2, %v204_v26 }
 0x1bc   :  { %298 = shalt.err (!%p295_p4)
}
 0x1bd   :  { %s299_s19 = scalar_lea.hbm %s400_s5, 128 }
 0x1be   :  { %p300_p5 = scmp.ne.s32.totalorder %s400_s5, %s299_s19  ;;  %p303_p6 = scmp.lt.u32.totalorder %s299_s19, %s400_s5 }
 0x1c0   :  { %p305_p7 = pnand %p303_p6, %p300_p5 }
 0x1c2   :  { %308 = shalt.err (!%p305_p7)
}
 0x1c3   :  { %216 = dma.vmem_to_hbm [thread:$0]  %s214_s3, 128, %s400_s5, [#allocation3]  }
 0x1c4   :  { %309 = dma.done.wait [#allocation3], 128  }
 0x1c5   :  { %310 = vsyncadd [#allocation3], 4294967168 }
 0x1c6   :  { %220 = vsyncpa [#allocation3], 1 }

// kernel: tpu_custom_call.1
= control target key start
LH: loop header
LB: loop body
LE: loop exit
PB: predicated region body
PF: predicated region fallthrough
CT: control target
= control target key end

     0   :  { %v311_v1 = vmov 0.0   ;;  %vm312_vm0 = vmmov 0   ;;  %vm47_vm1 = vcmask 261120   ;;  %s395_s0 = inlined_call_operand.vmem [shape: f32[8,32], index: 0, kind: input, shape index: {}]   ;;  %s396_s1 = inlined_call_operand.vmem [shape: bf16[32,128], index: 1, kind: input, shape index: {}]   ;;  %s397_s2 = inlined_call_operand.vmem [shape: f32[1,128], index: 2, kind: input, shape index: {}]   ;;  %s398_s3 = inlined_call_operand.vmem [shape: bf16[128,8], index: 3, kind: input, shape index: {}]   ;;  %s399_s4 = inlined_call_operand.vmem [shape: f32[1,8], index: 4, kind: input, shape index: {}]   ;;  %s400_s5 = inlined_call_operand.hbm [shape: f32[8,8], index: 5, kind: output, shape index: {}]  }
   0x1   :  { %v277_v0 = vld [vmem:[%s396_s1] sm:$0xff]   ;;  %246 = vmatprep.subr.bf16.mxu0 %v311_v1  ;;  %v278_v2 = vld [vmem:[%s396_s1 + $0x8] sm:$0xff]   ;;  %254 = vmatprep.subr.bf16.mxu1 %v311_v1  ;;  %v281_v7 = vld [vmem:[%s398_s3 + $0x10] sm:$0xff]  }
   0x2   :  { %247 = vmatpush3.bf16.msra.mxu0 %v277_v0  ;;  %250 = vmatprep.mubr.msk.bf16.mxu0 %vm312_vm0, %v311_v1  ;;  %v22_v3 = vld [vmem:[%s395_s0] sm:$0xff]  ;;  %v280_v6 = vld [vmem:[%s398_s3 + $0x8] sm:$0xff]  }
   0x3   :  { %248 = vmatprep.subr.bf16.mxu0 %v311_v1  ;;  %v279_v4 = vld [vmem:[%s398_s3] sm:$0xff]   ;;  %270 = vmatprep.mubr.msk.bf16.mxu1 %vm312_vm0, %v311_v1  ;;  %v23_v5 = vpack.c.bf16 %v22_v3, %v22_v3 }
   0x4   :  { %255 = vmatpush3.bf16.msra.mxu1 %v279_v4 }
   0x5   :  { %256 = vmatprep.subr.bf16.mxu1 %v311_v1 }
   0x6   :  { %249 = vmatpush3.bf16.msra.mxu0 %v278_v2 }
   0x8   :  { %257 = vmatpush3.bf16.msra.mxu1 %v280_v6 }
   0x9   :  { %251 = vmatmul.mubr.msk.bf16.vlgmr.msra.gmra.mrb[0].mxu0 %vm47_vm1, %v23_v5  ;;  %258 = vmatprep.subr.bf16.mxu1 %v311_v1 }
   0xa   :  { %10 = vsyncpa [#allocation3], 0  ;;  %v282_v8 = vld [vmem:[%s398_s3 + $0x18] sm:$0xff]   ;;  %v283_v9 = vld [vmem:[%s398_s3 + $0x20] sm:$0xff]   ;;  %s313_s17 = smov [#allocation2]   ;;  %vm205_vm2 = vcmask 64512  }
   0xb   :  { %v284_v10 = vld [vmem:[%s398_s3 + $0x28] sm:$0xff]   ;;  %v285_v11 = vld [vmem:[%s398_s3 + $0x30] sm:$0xff]   ;;  %v286_v12 = vld [vmem:[%s398_s3 + $0x38] sm:$0xff]   ;;  %s213_s3 = sshll.u32 %s313_s17, 4  ;;  %s214_s3 = int_to_ptr.vmem [resolvable:$true] %s213_s3 }
   0xc   :  { %259 = vmatpush3.bf16.msra.mxu1 %v281_v7  ;;  %v221_v13 = vld [vmem:[%s397_s2] ss:$0 sm:$0xff]  ;;  %s287_s2 = scalar_lea.vmem %s214_s3, 128  ;;  %p292_p1 = scmp.lt.s32.totalorder %s214_s3, %s214_s3 }
   0xd   :  { %260 = vmatprep.subr.bf16.mxu1 %v311_v1  ;;  %v225_v21 = vld [vmem:[%s399_s4] ss:$0 sm:$0xff]  ;;  %p288_p0 = scmp.ne.s32.totalorder %s214_s3, %s287_s2  ;;  %p293_p2 = scmp.lt.s32.totalorder %s287_s2, %s287_s2 }
   0xf   :  { %p294_p3 = por %p293_p2, %p292_p1 }
  0x10   :  { %261 = vmatpush3.bf16.msra.mxu1 %v282_v8 }
  0x11   :  { %262 = vmatprep.subr.bf16.mxu1 %v311_v1  ;;  %p295_p4 = pnand %p294_p3, %p288_p0 }
  0x14   :  { %263 = vmatpush3.bf16.msra.mxu1 %v283_v9 }
  0x15   :  { %264 = vmatprep.subr.bf16.mxu1 %v311_v1 }
  0x18   :  { %265 = vmatpush3.bf16.msra.mxu1 %v284_v10 }
  0x19   :  { %266 = vmatprep.subr.bf16.mxu1 %v311_v1 }
  0x1c   :  { %267 = vmatpush3.bf16.msra.mxu1 %v285_v11 }
  0x1d   :  { %268 = vmatprep.subr.bf16.mxu1 %v311_v1 }
  0x20   :  { %269 = vmatpush3.bf16.msra.mxu1 %v286_v12 }
  0xdc   :  { %v85_v14 = vpop.f32.mrb[0].mxu0 }
  0xdd   :  { %v86_v15 = vadd.f32 %v221_v13, %v85_v14  ;;  %v252_v16 = vpop.f32.mrb[1].mxu0 }
  0xde   :  { %v88_v17 = vpop.f32.mrb[2].mxu0 }
  0xdf   :  { %v91_v18 = vmax.f32 %v86_v15, 0.0  ;;  %v253_v19 = vpop.f32.mrb[3].mxu0 }
  0xe1   :  { %v92_v20 = vpack.c.bf16 %v91_v18, %v91_v18 }
  0xe3   :  { %271 = vmatmul.mubr.bf16.vlgmr.msra.gmra.mrb[0].mxu1 %v92_v20 }
 0x1b6   :  { %v198_v22 = vpop.f32.mrb[0].mxu1 }
 0x1b7   :  { %v199_v23 = vadd.f32 %v225_v21, %v198_v22  ;;  %v272_v24 = vpop.f32.mrb[1].mxu1 }
 0x1b8   :  { %v201_v25 = vpop.f32.mrb[2].mxu1 }
 0x1b9   :  { %v204_v26 = vmax.f32 %v199_v23, 0.0  ;;  %v273_v27 = vpop.f32.mrb[3].mxu1 }
 0x1bb   :  { %206 = vst.msk [vmem:[#allocation2] sm:$0xff] %vm205_vm2, %v204_v26 }
 0x1bc   :  { %298 = shalt.err (!%p295_p4)
}
 0x1bd   :  { %s299_s19 = scalar_lea.hbm %s400_s5, 128 }
 0x1be   :  { %p300_p5 = scmp.ne.s32.totalorder %s400_s5, %s299_s19  ;;  %p303_p6 = scmp.lt.u32.totalorder %s299_s19, %s400_s5 }
 0x1c0   :  { %p305_p7 = pnand %p303_p6, %p300_p5 }
 0x1c2   :  { %308 = shalt.err (!%p305_p7)
}
 0x1c3   :  { %216 = dma.vmem_to_hbm [thread:$0]  %s214_s3, 128, %s400_s5, [#allocation3]  }
 0x1c4   :  { %309 = dma.done.wait [#allocation3], 128  }
 0x1c5   :  { %310 = vsyncadd [#allocation3], 4294967168 }
 0x1c6   :  { %220 = vsyncpa [#allocation3], 1 }

</bundles_post_ra>
